<compile_context>
chip_gen: v7x
topology: tpu7x:2x2x1
jax: 0.10.0
libtpu: 0.0.40
codegen_flags: <defaults>
</compile_context>

<pallas_src>
import jax
import jax.numpy as jnp
from jax.experimental import pallas as pl
from jax.experimental.pallas import tpu as pltpu


def _bcast_store_kernel(y_ref, o_ref):
    """Broadcast the per-batch channel vector over a dense (rows, 128) pixel tile.

    y_ref: (1, C, 1, 1)      pre-projected output channels for this batch element
    o_ref: (1, C, TR, 128)   output tile; pixel-rows on sublanes, 128 pixels on lanes
    """
    _, C, TR, L = o_ref.shape
    ebytes = jnp.dtype(o_ref.dtype).itemsize

    # Keep the live broadcast slab ~<=128 KiB (32 f32 vregs): stores stream at
    # full (unmasked) vst rate with no spilling, independent of block size.
    # (C == query_dim is small for this module; no channel chunking needed.)
    slab_bytes = 128 * 1024
    slab_rows = (slab_bytes // (C * L * ebytes)) // 8 * 8
    slab_rows = TR if TR <= max(8, slab_rows) else max(8, slab_rows)

    slab = jnp.broadcast_to(y_ref[0], (C, slab_rows, L)).astype(o_ref.dtype)

    if slab_rows == TR:
        # Small tile: single whole-block store.
        o_ref[0] = slab
    else:
        n_full, rem = divmod(TR, slab_rows)

        def body(i, carry):
            r = pl.multiple_of(i * slab_rows, slab_rows)
            o_ref[0, :, pl.ds(r, slab_rows), :] = slab
            return carry

        jax.lax.fori_loop(0, n_full, body, 0)
        if rem:
            o_ref[0, :, pl.ds(n_full * slab_rows, rem), :] = slab[:, :rem, :]


def chunked_value_cross_attn(x, context, params, *, heads=8, dim_head=4, chunk_size=8):
    """x: [B, C, H, W] (NCHW, as PyTorch), context: [B, D]. Returns [B, C, H, W]."""
    wq, wk, wv, wo, bo = params
    del wq, wk  # provably dead: softmax over a length-1 context axis is identically 1
    B, C, H, W = x.shape
    cs = chunk_size
    assert H % cs == 0 and W % cs == 0, f"Dimensions must be divisible by {cs}, got H:{H} W:{W}"
    HW = H * W
    dtype = x.dtype
    ebytes = jnp.dtype(dtype).itemsize

    # ---- tiny per-batch projection, hoisted out of the kernel (perf review) ----
    # attn @ v == v (length-1 softmax), so the whole forward is
    #   y[b, :] = to_out.conv(to_v(context[b])) + bias, broadcast over all pixels.
    v = jnp.dot(context, wv.T, preferred_element_type=jnp.float32)   # [B, inner]
    y = jnp.dot(v, wo.T, preferred_element_type=jnp.float32) + bo    # [B, C]
    y4 = y[:, :, None, None]                                         # [B, C, 1, 1]

    # ---- sublane+lane dense output layout: [B, C, R, 128], R = ceil(HW / 128) ----
    LANES = 128
    R = pl.cdiv(HW, LANES)

    # ~12 MiB per output block: <=24 MiB double-buffered (fits v7x's 64 MiB VMEM),
    # and large enough that per-step overhead is negligible vs HBM writeback.
    target_block_bytes = 12 * 1024 * 1024
    rows_budget = max(8, (target_block_bytes // (C * LANES * ebytes)) // 8 * 8)
    t_rows = R if R <= rows_budget else rows_budget
    num_tiles = pl.cdiv(R, t_rows)

    # v7x has 2 TensorCores per chip: ensure >= 2 grid steps when there is enough work.
    if B * num_tiles < 2 and R >= 16:
        t_rows = max(8, ((pl.cdiv(R, 2) + 7) // 8) * 8)
        num_tiles = pl.cdiv(R, t_rows)

    block_bytes = C * t_rows * LANES * ebytes
    vmem_limit = int(min(56 * 1024 * 1024, 2 * block_bytes + 16 * 1024 * 1024))

    out4 = pl.pallas_call(
        _bcast_store_kernel,
        out_shape=jax.ShapeDtypeStruct((B, C, R, LANES), dtype),
        grid_spec=pltpu.PrefetchScalarGridSpec(
            num_scalar_prefetch=0,
            grid=(B, num_tiles),
            in_specs=[pl.BlockSpec((1, C, 1, 1), lambda b, p: (b, 0, 0, 0))],
            out_specs=pl.BlockSpec((1, C, t_rows, LANES), lambda b, p: (b, 0, p, 0)),
        ),
        compiler_params=pltpu.CompilerParams(
            dimension_semantics=("parallel", "parallel"),
            vmem_limit_bytes=vmem_limit),
    )(y4)

    # [B, C, R*128] -> drop lane padding (no-op when HW % 128 == 0) -> NCHW.
    out = out4.reshape(B, C, R * LANES)
    if R * LANES != HW:
        out = out[:, :, :HW]
    return out.reshape(B, C, H, W)
    # TODO(synk): nn.Dropout(p=0.1) in to_out is stochastic in train mode; implemented
    # here as identity (eval-mode semantics).


def _reference(x, context, params, *, heads=8, dim_head=4, chunk_size=8):
    """Plain-JAX mirror of the full PyTorch forward, including the (degenerate)
    q/k/softmax path, used to verify the collapsed kernel (dropout = identity)."""
    wq, wk, wv, wo, bo = params
    B, C, H, W = x.shape
    cs = chunk_size
    nh, nw = H // cs, W // cs
    Bn = B * nh * nw
    P = cs * cs
    scale = dim_head ** (-0.5)

    x_chunks = (x.reshape(B, C, nh, cs, nw, cs)
                 .transpose(0, 2, 4, 3, 5, 1)
                 .reshape(Bn, P, C))
    q = x_chunks @ wq.T                                        # [Bn, P, inner]
    ctx = jnp.repeat(context, nh * nw, axis=0)[:, None, :]     # [Bn, 1, D]
    k = ctx @ wk.T                                             # [Bn, 1, inner]
    v = ctx @ wv.T                                             # [Bn, 1, inner]
    logits = jnp.einsum("bpi,bsi->bps", q, k) * scale          # [Bn, P, 1]
    attn = jax.nn.softmax(logits, axis=-1)
    out = jnp.einsum("bps,bsi->bpi", attn, v)                  # [Bn, P, inner]
    y = out @ wo.T + bo                                        # [Bn, P, C]
    return (y.reshape(B, nh, nw, cs, cs, C)
             .transpose(0, 5, 1, 3, 2, 4)
             .reshape(B, C, H, W))


if __name__ == "__main__":
    # Module config (small): query_dim=4, context_dim=16, heads=8, dim_head=4, chunk_size=8
    B, C, H, W = 2, 4, 16, 16
    D = 16
    heads, dim_head, cs = 8, 4, 8
    inner = heads * dim_head

    key = jax.random.PRNGKey(0)
    kq, kk, kv, ko, kb, kx, kc = jax.random.split(key, 7)
    # deterministic synthetic parameters (shapes match the PyTorch module's layers)
    wq = jax.random.normal(kq, (inner, C), jnp.float32) * 0.1   # to_q Conv2d 1x1, no bias
    wk = jax.random.normal(kk, (inner, D), jnp.float32) * 0.1   # to_k Linear, no bias
    wv = jax.random.normal(kv, (inner, D), jnp.float32) * 0.1   # to_v Linear, no bias
    wo = jax.random.normal(ko, (C, inner), jnp.float32) * 0.1   # to_out Conv2d 1x1 weight
    bo = jax.random.normal(kb, (C,), jnp.float32) * 0.1         # to_out Conv2d 1x1 bias
    params = (wq, wk, wv, wo, bo)

    x = jax.random.normal(kx, (B, C, H, W), jnp.float32)
    context = jax.random.normal(kc, (B, D), jnp.float32)

    out = chunked_value_cross_attn(x, context, params,
                                   heads=heads, dim_head=dim_head, chunk_size=cs)
    out = jax.block_until_ready(out)

    ref = _reference(x, context, params, heads=heads, dim_head=dim_head, chunk_size=cs)
    assert out.shape == (B, C, H, W)
    assert jnp.allclose(out, ref, rtol=1e-5, atol=1e-5), "Pallas kernel mismatch vs reference"

    print("KERNEL_OK")
</pallas_src>

<mosaic_0001>
module attributes {stable_mosaic.version = 11 : i64} {
  func.func @_bcast_store_kernel(%arg0: i32, %arg1: i32, %arg2: memref<1x4x1x1xf32, #tpu.memory_space<vmem>>, %arg3: memref<1x4x2x128xf32, #tpu.memory_space<vmem>>) attributes {dimension_semantics = [#tpu.dimension_semantics<parallel>, #tpu.dimension_semantics<parallel>], iteration_bounds = array<i64: 2, 1>, scalar_prefetch = 0 : i64, scratch_operands = 0 : i64, tpu.core_type = #tpu.core_type<tc>, window_params = [{transform_indices = @transform_0, window_bounds = array<i64: 1, 4, 1, 1>}, {transform_indices = @transform_1, window_bounds = array<i64: 1, 4, 2, 128>}]} {
    %c0 = arith.constant 0 : index
    %c0_0 = arith.constant 0 : index
    %c0_1 = arith.constant 0 : index
    %c0_2 = arith.constant 0 : index
    %0 = vector.load %arg2[%c0, %c0_0, %c0_1, %c0_2] : memref<1x4x1x1xf32, #tpu.memory_space<vmem>>, vector<1x4x1x1xf32>
    %1 = vector.shape_cast %0 : vector<1x4x1x1xf32> to vector<4x1x1xf32>
    %2 = vector.shape_cast %1 : vector<4x1x1xf32> to vector<4x1x1xf32>
    %3 = vector.broadcast %2 : vector<4x1x1xf32> to vector<4x2x128xf32>
    %c0_3 = arith.constant 0 : index
    %c0_4 = arith.constant 0 : index
    %c0_5 = arith.constant 0 : index
    %c0_6 = arith.constant 0 : index
    %4 = vector.load %arg3[%c0_3, %c0_4, %c0_5, %c0_6] : memref<1x4x2x128xf32, #tpu.memory_space<vmem>>, vector<1x4x2x128xf32>
    %5 = vector.shape_cast %4 : vector<1x4x2x128xf32> to vector<4x2x128xf32>
    %6 = vector.shape_cast %3 : vector<4x2x128xf32> to vector<1x4x2x128xf32>
    tpu.vector_store %arg3[%c0_3, %c0_4, %c0_5, %c0_6], %6 {strides = array<i32>} : memref<1x4x2x128xf32, #tpu.memory_space<vmem>>, vector<1x4x2x128xf32>,
    return
  }
  func.func @transform_0(%arg0: i32, %arg1: i32) -> (i32, i32, i32, i32) {
    %c0_i32 = arith.constant 0 : i32
    %c0_i32_0 = arith.constant 0 : i32
    %c0_i32_1 = arith.constant 0 : i32
    %c0_i32_2 = arith.constant 0 : i32
    return %arg0, %c0_i32, %c0_i32_0, %c0_i32_1 : i32, i32, i32, i32
  }
  func.func @transform_1(%arg0: i32, %arg1: i32) -> (i32, i32, i32, i32) {
    %c0_i32 = arith.constant 0 : i32
    %c0_i32_0 = arith.constant 0 : i32
    %c0_i32_1 = arith.constant 0 : i32
    return %arg0, %c0_i32, %arg1, %c0_i32_0 : i32, i32, i32, i32
  }
}

</mosaic_0001>

<bundles_post_ra>
// kernel: tpu_custom_call.1
= control target key start
LH: loop header
LB: loop body
LE: loop exit
PB: predicated region body
PF: predicated region fallthrough
CT: control target
= control target key end

     0   :  { %6 = vsyncpa [#allocation3], 0  ;;  %s543_s0 = inlined_call_operand.vmem [shape: f32[2,4,1,1], index: 0, kind: input, shape index: {}]   ;;  %s544_s1 = inlined_call_operand.hbm [shape: f32[2,4,2,128], index: 1, kind: output, shape index: {}]  }
   0x1   :  { %8 = vsyncpa [#allocation3 + $0x1], 0  ;;  %s428_s6 = smov 0   ;;  %s430_s7 = smov 0  }
   0x2   :  { %s432_s8 = smov 0   ;;  %s434_s9 = smov 0  }
   0x3   :  { %s436_s10 = smov 0   ;;  %s438_s11 = smov 0  }
   0x4 LB: > { %s257_s12 = sadd.s32 4294967295, %s412_s11   ;;  %s258_s13 = sadd.s32 4294967294, %s412_s11   ;;  %s412_s11 = sphi %s438_s11, %s14_s11   ;;  %s408_s10 = sphi %s436_s10, %s551_s10   ;;  %s404_s9 = sphi %s434_s9, %s550_s9   ;;  %s400_s8 = sphi %s432_s8, %s549_s8   ;;  %s396_s7 = sphi %s430_s7, %s548_s7   ;;  %s392_s6 = sphi %s428_s6, %s547_s6  }
   0x5   : > { %s26_s14 = sadd.s32 1, %s408_s10  ;;  %s61_s15 = sadd.s32 1, %s400_s8 }
   0x6   : > { %p28_p0 = scmp.ge.s32.totalorder %s26_s14, 2  ;;  %p71_p1 = scmp.ne.s32.totalorder %s400_s8, %s396_s7 }
   0x7   : > { %p72_p2 = scmp.eq.s32.totalorder %s257_s12, 1  ;;  %p77_p3 = scmp.ne.s32.totalorder %s396_s7, %s392_s6 }
   0x8   : > { %s553_s14 = smov (%p28_p0, %s26_s14), 0  ;;  %p78_p5 = scmp.eq.s32.totalorder %s258_s13, 1 }
   0x9   : > { %p468_p4 = por %p72_p2, %p71_p1  ;;  %s56_s17 = ssub.s32 %s408_s10, %s553_s14 }
   0xa   : > { %p261_p6 = scmp.ge.s32.totalorder %s412_s11, 1  ;;  %p59_p7 = scmp.eq.s32.totalorder %s56_s17, 0 }
   0xb   : > { %p475_p8 = por %p78_p5, %p77_p3  ;;  %p103_p9 = scmp.lt.s32.totalorder %s412_s11, 3 }
   0xc   : > { %s481_s19 = scalar_select %p59_p7, %s400_s8, %s61_s15  }
   0xd   : > { %p104_p10 = pnand %p261_p6, %p103_p9 }
   0xe   : > { %p122_p11 = scmp.lt.s32.totalorder (!%p104_p10), %s404_s9, 1  ;;  %v414_v0 = vmov (!%p104_p10), 0   ;;  %s119_s25 = sand.u32 (!%p104_p10), 1, %s396_s7  }
   0xf   : > { %107 = sbr.rel (%p104_p10) target bundleno = 174 (0xae), region = 24  ;;  %333 = vset.pattern.permute.xlu1 (!%p104_p10), %v414_v0  ;;  %332 = vset.pattern.permute.xlu0 (!%p104_p10), %v414_v0  ;;  %s262_s26 = sshll.u32 (!%p104_p10), %s119_s25, 3 }
  0x10   : > { %s121_s27 = scalar_lea.vmem (!%p104_p10), [#allocation2], %s262_s26  ;;  %s273_s29 = sshll.u32 (!%p104_p10), %s404_s9, 7 }
  0x11   : > { %s185_s28 = sshll.u32 (!%p104_p10), %s121_s27, 4  ;;  %s495_s3 = scalar_lea.hbm (!%p104_p10), %s544_s1, %s273_s29  ;;  %s490_s28 = int_to_ptr.vmem [resolvable:$true] %s185_s28 }
  0x12   : > { %s497_s4 = scalar_lea.sflag (!%p104_p10), [#allocation3], %s119_s25  ;;  %s334_s5 = scalar_lea.vmem (!%p104_p10), %s490_s28, 128 }
  0x13   : > { %p335_p12 = scmp.ne.s32.totalorder (!%p104_p10), %s490_s28, %s334_s5 }
  0x15   : > { %p336_p13 = pnand (!%p104_p10), %p335_p12, %p468_p4 }
  0x16   : > { %s123_s20 = scalar_select %p122_p11, %s404_s9, 1 }
  0x17   : > { %p337_p0 = pneg %p336_p13  ;;  %s415_s9 = smov [#allocation2]  }
  0x18   : > { %s263_s21 = sshll.u32 %s123_s20, 2  ;;  %s338_s12 = sshll.u32 %s415_s9, 4  ;;  %s339_s12 = int_to_ptr.vmem [resolvable:$false] %s338_s12 }
  0x19   : > { %s125_s24 = scalar_lea.vmem %s543_s0, %s263_s21  ;;  %s340_s13 = scalar_lea.vmem %s339_s12, 256 }
  0x1a   : > { %v266_v1 = vld [vmem:[%s125_s24 + $0x2] ss:$0 sm:$0xff]  ;;  %v264_v2 = vld [vmem:[%s125_s24] ss:$0 sm:$0xff]  ;;  %v267_v3 = vld [vmem:[%s125_s24 + $0x3] ss:$0 sm:$0xff]  ;;  %p341_p1 = scmp.lt.s32.totalorder %s490_s28, %s339_s12  ;;  %p342_p2 = scmp.lt.s32.totalorder %s340_s13, %s334_s5 }
  0x1b   : > { %159 = vperm.xlu1 %333, %v266_v1   ;;  %151 = vperm.xlu0 %332, %v264_v2   ;;  %v265_v4 = vld [vmem:[%s125_s24 + $0x1] ss:$0 sm:$0xff] }
  0x1c   : > { %p343_p3 = por %p342_p2, %p341_p1 }
  0x1e   : > { %p344_p5 = pnand %p343_p3, %p337_p0 }
  0x1f   : > { %163 = vperm.xlu1 %333, %v267_v3   ;;  %155 = vperm.xlu0 %332, %v265_v4  }
  0x9a   : > { %v160_v5 = vpop.permute.xlu1 %159  ;;  %v152_v6 = vpop.permute.xlu0 %151 }
  0x9b   : > { %168 = vst [vmem:[%s121_s27 + $0x4] sm:$0x3] %v160_v5  ;;  %166 = vst [vmem:[%s121_s27] sm:$0x3] %v152_v6 }
  0x9e   : > { %v164_v7 = vpop.permute.xlu1 %163  ;;  %v156_v8 = vpop.permute.xlu0 %155 }
  0x9f   : > { %169 = vst [vmem:[%s121_s27 + $0x6] sm:$0x3] %v164_v7  ;;  %167 = vst [vmem:[%s121_s27 + $0x2] sm:$0x3] %v156_v8 }
  0xa0   : > { %347 = shalt.err (!%p344_p5)
}
  0xa1   : > { %s348_s15 = scalar_lea.hbm %s495_s3, 128  ;;  %s352_s21 = scalar_lea.hbm %s544_s1, 256 }
  0xa2   : > { %p349_p6 = scmp.ne.s32.totalorder %s495_s3, %s348_s15  ;;  %p353_p10 = scmp.lt.u32.totalorder %s495_s3, %s544_s1 }
  0xa3   : > { %p354_p11 = scmp.lt.u32.totalorder %s352_s21, %s348_s15  ;;  %p356_p13 = scmp.lt.u32.totalorder %s348_s15, %s495_s3 }
  0xa4   : > { %p350_p7 = pnand %p349_p6, %p468_p4 }
  0xa5   : > { %p355_p12 = por %p354_p11, %p353_p10 }
  0xa6   : > { %p351_p9 = pneg %p350_p7 }
  0xa7   : > { %p357_p0 = por %p356_p13, %p355_p12 }
  0xa9   : > { %p358_p1 = pnand %p357_p0, %p351_p9 }
  0xab   : > { %361 = shalt.err (!%p358_p1)
}
  0xac   : > { %s416_s24 = smov 32   ;;  %s417_s25 = smov 2  }
  0xad   : > { %274 = dma.vmem_to_hbm [thread:$0]  (%p468_p4), %s490_s28, 128, %s495_s3, %s497_s4, %s416_s24, %s416_s24, %s417_s25  }
  0xae PF: > { %p280_p2 = scmp.ge.s32.totalorder %s412_s11, 2  ;;  %s200_s26 = sand.u32 1, %s392_s6  }
  0xaf   : > { %s201_s27 = scalar_lea.sflag [#allocation3], %s200_s26 }
  0xb0   : > { %p277_p3 = pnand %p280_p2, %p475_p8 }
  0xb2   : > { %387 = dma.done.wait (!%p277_p3), %s201_s27, 128  }
  0xb3   : > { %389 = vsyncadd (!%p277_p3), %s201_s27, 4294967168  ;;  %s14_s11 = sadd.s32 1, %s412_s11   ;;  %s547_s6 = smov %s396_s7 }
  0xb4   : > { %p11_p5 = scmp.ge.s32.totalorder %s14_s11, 4   ;;  %s548_s7 = smov %s400_s8 }
  0xb5   : > { %s549_s8 = smov %s481_s19  ;;  %s550_s9 = smov %s408_s10 }
  0xb6   : > { %s551_s10 = smov %s553_s14  ;;  %13 = sbr.rel (!%p11_p5) target bundleno = 4 (0x4), region = 59 }
  0xbd   :  { %206 = vsyncpa [#allocation3], 1 }
  0xbe   :  { %208 = vsyncpa [#allocation3 + $0x1], 1 }

</bundles_post_ra>
